<compile_context>
chip_gen: v5e
topology: v5e:2x2
jax: 0.10.0
libtpu: 0.0.40
codegen_flags: <defaults>
</compile_context>

<pallas_src>
import functools

import jax
import jax.numpy as jnp
from jax.experimental import pallas as pl
from jax.experimental.pallas import tpu as pltpu


def _cdiv(a, b):
    return (a + b - 1) // b


def _round_up(n, m):
    return ((n + m - 1) // m) * m


def _softplus_torch(x):
    # torch.nn.Softplus(beta=1.0, threshold=20.0): linear above the threshold.
    return jnp.where(x > 20.0, x, jnp.log1p(jnp.exp(jnp.minimum(x, 20.0))))


# ---------------------------------------------------------------------------
# Kernel (features on sublanes, batch on lanes)
# ---------------------------------------------------------------------------

def deep_normal_kernel(x_ref, w1_ref, w2_ref, wh1_ref, wh2_ref,
                       b1_ref, b2_ref, bh1_ref, bh2_ref, out_ref,
                       *, std_offset, scale):
    f32 = jnp.float32
    bf16 = jnp.bfloat16

    xt = x_ref[...]                                               # (n_in, tb) bf16

    # ---- shared trunk: Linear->ReLU->(Dropout=id), Linear->Tanh->(Dropout=id)
    h = jnp.dot(w1_ref[...], xt, preferred_element_type=f32) + b1_ref[...]
    h = jnp.maximum(h, 0.0)
    h = jnp.dot(w2_ref[...], h.astype(bf16), preferred_element_type=f32) + b2_ref[...]
    h = jnp.tanh(h)

    # ---- fused mean/std heads (softplus_factor folded into the std rows of
    #      wh1, loc folded into bh2 row 0).  One lane-dense intermediate.
    z = jnp.dot(wh1_ref[...], h.astype(bf16), preferred_element_type=f32) + bh1_ref[...]
    z = jnp.maximum(z, 0.0)
    y = jnp.dot(wh2_ref[...], z.astype(bf16), preferred_element_type=f32) + bh2_ref[...]
    # y: (8, tb); row 0 = mu, row 1 = pre-softplus std, rows 2..7 unused.

    out_ref[0:1, :] = y[0:1, :]                                   # mu
    sp = _softplus_torch(y[1:2, :])
    if scale != 1.0:                                              # static fold
        sp = sp * scale
    out_ref[1:2, :] = std_offset + sp                             # sigma


# ---------------------------------------------------------------------------
# Wrapper
# ---------------------------------------------------------------------------

def _choose_tiling(batch, block_b):
    """grid first, then tile size (multiple of 128 lanes), minimal padding."""
    grid = max(_cdiv(batch, block_b), 1)
    # v7x megacore: give both TensorCores work when the batch allows it.
    if batch > 128 and grid < 2:
        grid = 2
    tb = _round_up(_cdiv(batch, grid), 128)
    return tb, tb * grid, grid


def deep_normal_regressor(x, packed_params, *, std_offset=0.001, scale=1.0,
                          block_b=1024):
    """Fused forward pass. Returns (mu, sigma), each (B, 1) float32."""
    (w1t, w2t, wh1t, wh2t, b1t, b2t, bh1t, bh2t) = packed_params
    B, n_in = x.shape
    h1 = w1t.shape[0]
    h2 = w2t.shape[0]
    nh = wh1t.shape[0]

    tb, b_pad, grid = _choose_tiling(B, block_b)

    # Lane-dense (features, batch) layout; bf16 matmul inputs (layout plumbing
    # in the wrapper, not compute).
    xt = x.T.astype(jnp.bfloat16)
    if b_pad != B:
        xt = jnp.pad(xt, ((0, 0), (0, b_pad - B)))

    kern = functools.partial(deep_normal_kernel,
                             std_offset=float(std_offset), scale=float(scale))

    def resident(arr):
        # full-array block, constant index_map -> loaded once, VMEM-resident
        return pl.BlockSpec(arr.shape, lambda i: (0, 0))

    flops = 2 * b_pad * (n_in * h1 + h1 * h2 + h2 * nh + nh * 8)
    transcendentals = b_pad * (h2 + 2)            # tanh row block + softplus
    bytes_accessed = int(xt.size) * 2 + 2 * b_pad * 4 + sum(
        int(a.size) * a.dtype.itemsize for a in packed_params)

    out = pl.pallas_call(
        kern,
        out_shape=jax.ShapeDtypeStruct((2, b_pad), jnp.float32),
        grid=(grid,),
        in_specs=[pl.BlockSpec((n_in, tb), lambda i: (0, i)),
                  resident(w1t), resident(w2t), resident(wh1t), resident(wh2t),
                  resident(b1t), resident(b2t), resident(bh1t), resident(bh2t)],
        out_specs=pl.BlockSpec((2, tb), lambda i: (0, i)),
        compiler_params=pltpu.CompilerParams(
            dimension_semantics=("parallel",)),
        cost_estimate=pl.CostEstimate(flops=flops,
                                      transcendentals=transcendentals,
                                      bytes_accessed=bytes_accessed),
    )(xt, w1t, w2t, wh1t, wh2t, b1t, b2t, bh1t, bh2t)

    mu = out[0:1, :B].T       # (B, 1)
    sigma = out[1:2, :B].T    # (B, 1)
    return mu, sigma


# ---------------------------------------------------------------------------
# Parameter construction (PyTorch-equivalent raw params + packing for kernel)
# ---------------------------------------------------------------------------

def _init_linear(key, fan_in, fan_out):
    """nn.Linear default init; weight stored as (in,out), bias (1,out)."""
    k = 1.0 / jnp.sqrt(jnp.float32(fan_in))
    kw, kb = jax.random.split(key)
    w = jax.random.uniform(kw, (fan_in, fan_out), jnp.float32, -k, k)
    b = jax.random.uniform(kb, (1, fan_out), jnp.float32, -k, k)
    return w, b


def make_raw_params(key, n_inputs, hidden1, hidden2, n_units_mean, n_units_std):
    keys = jax.random.split(key, 6)
    w1, b1 = _init_linear(keys[0], n_inputs, hidden1)
    w2, b2 = _init_linear(keys[1], hidden1, hidden2)
    wm1, bm1 = _init_linear(keys[2], hidden2, n_units_mean)
    wm2, bm2 = _init_linear(keys[3], n_units_mean, 1)
    ws1, bs1 = _init_linear(keys[4], hidden2, n_units_std)
    ws2, bs2 = _init_linear(keys[5], n_units_std, 1)
    return (w1, b1, w2, b2, wm1, bm1, wm2, bm2, ws1, bs1, ws2, bs2)


def pack_params(raw, *, softplus_factor, loc):
    """Transpose to (out,in), fuse the two heads, cast matmul weights to bf16."""
    (w1, b1, w2, b2, wm1, bm1, wm2, bm2, ws1, bs1, ws2, bs2) = raw
    nm = wm1.shape[1]
    ns = ws1.shape[1]
    nh = nm + ns
    bf16 = jnp.bfloat16

    w1t = w1.T                                            # (h1, n_in)
    w2t = w2.T                                            # (h2, h1)
    # fused head layer 1: rows [wm1.T ; softplus_factor * ws1.T] -> (nh, h2)
    wh1t = jnp.concatenate([wm1.T, softplus_factor * ws1.T], axis=0)
    # fused head layer 2, block diagonal, zero-padded to 8 rows: (8, nh)
    wh2t = jnp.zeros((8, nh), jnp.float32)
    wh2t = wh2t.at[0, :nm].set(wm2[:, 0]).at[1, nm:].set(ws2[:, 0])

    b1t = b1.T                                            # (h1, 1) f32
    b2t = b2.T                                            # (h2, 1) f32
    bh1t = jnp.concatenate([bm1, bs1], axis=1).T          # (nh, 1) f32
    bh2t = jnp.zeros((8, 1), jnp.float32)
    bh2t = bh2t.at[0, 0].set(bm2[0, 0] + loc).at[1, 0].set(bs2[0, 0])

    return (w1t.astype(bf16), w2t.astype(bf16),
            wh1t.astype(bf16), wh2t.astype(bf16),
            b1t, b2t, bh1t, bh2t)


def _reference(x, raw, *, std_offset, softplus_factor, loc, scale):
    """Plain-JAX f32 reference built from the unfused parameters."""
    (w1, b1, w2, b2, wm1, bm1, wm2, bm2, ws1, bs1, ws2, bs2) = raw
    h = jnp.maximum(x @ w1 + b1, 0.0)
    h = jnp.tanh(h @ w2 + b2)
    mu = jnp.maximum(h @ wm1 + bm1, 0.0) @ wm2 + bm2 + loc
    s = jnp.maximum((softplus_factor * h) @ ws1 + bs1, 0.0) @ ws2 + bs2
    sigma = std_offset + _softplus_torch(s) * scale
    return mu, sigma


if __name__ == "__main__":
    B = 256          # batch (exercises the 2-step parallel grid path)
    N_INPUTS = 8     # n_inputs
    H1, H2 = 32, 32  # shared trunk: layers=[(32,'relu',.1),(32,'tanh',.1)]
    N_MEAN, N_STD = 64, 64
    STD_OFFSET, SOFTPLUS_FACTOR, LOC, SCALE = 0.001, 0.05, 0.0, 1.0

    key = jax.random.PRNGKey(0)
    kx, kp = jax.random.split(key)
    x = jax.random.normal(kx, (B, N_INPUTS), jnp.float32)
    raw = make_raw_params(kp, N_INPUTS, H1, H2, N_MEAN, N_STD)
    packed = pack_params(raw, softplus_factor=SOFTPLUS_FACTOR, loc=LOC)

    mu, sigma = deep_normal_regressor(x, packed,
                                      std_offset=STD_OFFSET, scale=SCALE)
    jax.block_until_ready((mu, sigma))

    # Sanity check against the plain-JAX f32 reference (kernel uses bf16
    # matmul inputs with f32 accumulation, so tolerance is loosened).
    mu_ref, sigma_ref = _reference(x, raw, std_offset=STD_OFFSET,
                                   softplus_factor=SOFTPLUS_FACTOR,
                                   loc=LOC, scale=SCALE)
    assert mu.shape == (B, 1) and sigma.shape == (B, 1)
    assert bool(jnp.all(jnp.isfinite(mu))) and bool(jnp.all(jnp.isfinite(sigma)))
    assert jnp.allclose(mu, mu_ref, atol=3e-2, rtol=3e-2)
    assert jnp.allclose(sigma, sigma_ref, atol=3e-2, rtol=3e-2)
    assert bool(jnp.all(sigma > 0.0))

    print("KERNEL_OK")
</pallas_src>

<mosaic_0001>
module attributes {stable_mosaic.version = 11 : i64} {
  func.func @deep_normal_kernel(%arg0: i32, %arg1: memref<8x128xbf16, #tpu.memory_space<vmem>>, %arg2: memref<32x8xbf16, #tpu.memory_space<vmem>>, %arg3: memref<32x32xbf16, #tpu.memory_space<vmem>>, %arg4: memref<128x32xbf16, #tpu.memory_space<vmem>>, %arg5: memref<8x128xbf16, #tpu.memory_space<vmem>>, %arg6: memref<32x1xf32, #tpu.memory_space<vmem>>, %arg7: memref<32x1xf32, #tpu.memory_space<vmem>>, %arg8: memref<128x1xf32, #tpu.memory_space<vmem>>, %arg9: memref<8x1xf32, #tpu.memory_space<vmem>>, %arg10: memref<2x128xf32, #tpu.memory_space<vmem>>) attributes {dimension_semantics = [#tpu.dimension_semantics<parallel>], iteration_bounds = array<i64: 2>, scalar_prefetch = 0 : i64, scratch_operands = 0 : i64, tpu.core_type = #tpu.core_type<tc>, window_params = [{transform_indices = @transform_0, window_bounds = array<i64: 8, 128>}, {pipeline_mode = #tpu.pipeline_mode<synchronous>, transform_indices = @transform_1, window_bounds = array<i64: 32, 8>}, {pipeline_mode = #tpu.pipeline_mode<synchronous>, transform_indices = @transform_2, window_bounds = array<i64: 32, 32>}, {pipeline_mode = #tpu.pipeline_mode<synchronous>, transform_indices = @transform_3, window_bounds = array<i64: 128, 32>}, {pipeline_mode = #tpu.pipeline_mode<synchronous>, transform_indices = @transform_4, window_bounds = array<i64: 8, 128>}, {pipeline_mode = #tpu.pipeline_mode<synchronous>, transform_indices = @transform_5, window_bounds = array<i64: 32, 1>}, {pipeline_mode = #tpu.pipeline_mode<synchronous>, transform_indices = @transform_6, window_bounds = array<i64: 32, 1>}, {pipeline_mode = #tpu.pipeline_mode<synchronous>, transform_indices = @transform_7, window_bounds = array<i64: 128, 1>}, {pipeline_mode = #tpu.pipeline_mode<synchronous>, transform_indices = @transform_8, window_bounds = array<i64: 8, 1>}, {transform_indices = @transform_9, window_bounds = array<i64: 2, 128>}]} {
    %c0 = arith.constant 0 : index
    %c0_0 = arith.constant 0 : index
    %0 = vector.load %arg1[%c0, %c0_0] : memref<8x128xbf16, #tpu.memory_space<vmem>>, vector<8x128xbf16>
    %c0_1 = arith.constant 0 : index
    %c0_2 = arith.constant 0 : index
    %1 = vector.load %arg2[%c0_1, %c0_2] : memref<32x8xbf16, #tpu.memory_space<vmem>>, vector<32x8xbf16>
    %cst = arith.constant dense<0.000000e+00> : vector<32x128xf32>
    %2 = tpu.matmul %1, %0, %cst {dimension_numbers = #tpu.dot_dimension_numbers<[1], [0], [0], [1], [0, 0, 1, 1], [], []>} : vector<32x8xbf16>, vector<8x128xbf16>, vector<32x128xf32> -> vector<32x128xf32>
    %c0_3 = arith.constant 0 : index
    %c0_4 = arith.constant 0 : index
    %3 = vector.load %arg6[%c0_3, %c0_4] : memref<32x1xf32, #tpu.memory_space<vmem>>, vector<32x1xf32>
    %4 = vector.broadcast %3 : vector<32x1xf32> to vector<32x128xf32>
    %5 = arith.addf %2, %4 : vector<32x128xf32>
    %cst_5 = arith.constant 0.000000e+00 : f32
    %6 = vector.broadcast %cst_5 : f32 to vector<32x128xf32>
    %7 = arith.maximumf %5, %6 : vector<32x128xf32>
    %c0_6 = arith.constant 0 : index
    %c0_7 = arith.constant 0 : index
    %8 = vector.load %arg3[%c0_6, %c0_7] : memref<32x32xbf16, #tpu.memory_space<vmem>>, vector<32x32xbf16>
    %9 = arith.truncf %7 : vector<32x128xf32> to vector<32x128xbf16>
    %cst_8 = arith.constant dense<0.000000e+00> : vector<32x128xf32>
    %10 = tpu.matmul %8, %9, %cst_8 {dimension_numbers = #tpu.dot_dimension_numbers<[1], [0], [0], [1], [0, 0, 1, 1], [], []>} : vector<32x32xbf16>, vector<32x128xbf16>, vector<32x128xf32> -> vector<32x128xf32>
    %c0_9 = arith.constant 0 : index
    %c0_10 = arith.constant 0 : index
    %11 = vector.load %arg7[%c0_9, %c0_10] : memref<32x1xf32, #tpu.memory_space<vmem>>, vector<32x1xf32>
    %12 = vector.broadcast %11 : vector<32x1xf32> to vector<32x128xf32>
    %13 = arith.addf %10, %12 : vector<32x128xf32>
    %14 = math.tanh %13 : vector<32x128xf32>
    %c0_11 = arith.constant 0 : index
    %c0_12 = arith.constant 0 : index
    %15 = vector.load %arg4[%c0_11, %c0_12] : memref<128x32xbf16, #tpu.memory_space<vmem>>, vector<128x32xbf16>
    %16 = arith.truncf %14 : vector<32x128xf32> to vector<32x128xbf16>
    %cst_13 = arith.constant dense<0.000000e+00> : vector<128x128xf32>
    %17 = tpu.matmul %15, %16, %cst_13 {dimension_numbers = #tpu.dot_dimension_numbers<[1], [0], [0], [1], [0, 0, 1, 1], [], []>} : vector<128x32xbf16>, vector<32x128xbf16>, vector<128x128xf32> -> vector<128x128xf32>
    %c0_14 = arith.constant 0 : index
    %c0_15 = arith.constant 0 : index
    %18 = vector.load %arg8[%c0_14, %c0_15] : memref<128x1xf32, #tpu.memory_space<vmem>>, vector<128x1xf32>
    %19 = vector.broadcast %18 : vector<128x1xf32> to vector<128x128xf32>
    %20 = arith.addf %17, %19 : vector<128x128xf32>
    %cst_16 = arith.constant 0.000000e+00 : f32
    %21 = vector.broadcast %cst_16 : f32 to vector<128x128xf32>
    %22 = arith.maximumf %20, %21 : vector<128x128xf32>
    %c0_17 = arith.constant 0 : index
    %c0_18 = arith.constant 0 : index
    %23 = vector.load %arg5[%c0_17, %c0_18] : memref<8x128xbf16, #tpu.memory_space<vmem>>, vector<8x128xbf16>
    %24 = arith.truncf %22 : vector<128x128xf32> to vector<128x128xbf16>
    %cst_19 = arith.constant dense<0.000000e+00> : vector<8x128xf32>
    %25 = tpu.matmul %23, %24, %cst_19 {dimension_numbers = #tpu.dot_dimension_numbers<[1], [0], [0], [1], [0, 0, 1, 1], [], []>} : vector<8x128xbf16>, vector<128x128xbf16>, vector<8x128xf32> -> vector<8x128xf32>
    %c0_20 = arith.constant 0 : index
    %c0_21 = arith.constant 0 : index
    %26 = vector.load %arg9[%c0_20, %c0_21] : memref<8x1xf32, #tpu.memory_space<vmem>>, vector<8x1xf32>
    %27 = vector.broadcast %26 : vector<8x1xf32> to vector<8x128xf32>
    %28 = arith.addf %25, %27 : vector<8x128xf32>
    %29 = vector.extract_strided_slice %28 {offsets = [0, 0], sizes = [1, 128], strides = [1, 1]} : vector<8x128xf32> to vector<1x128xf32>
    %c0_22 = arith.constant 0 : index
    %c0_23 = arith.constant 0 : index
    %30 = vector.load %arg10[%c0_22, %c0_23] : memref<2x128xf32, #tpu.memory_space<vmem>>, vector<1x128xf32>
    tpu.vector_store %arg10[%c0_22, %c0_23], %29 {strides = array<i32>} : memref<2x128xf32, #tpu.memory_space<vmem>>, vector<1x128xf32>,
    %31 = vector.extract_strided_slice %28 {offsets = [1, 0], sizes = [1, 128], strides = [1, 1]} : vector<8x128xf32> to vector<1x128xf32>
    %cst_24 = arith.constant 2.000000e+01 : f32
    %32 = vector.broadcast %cst_24 : f32 to vector<1x128xf32>
    %33 = arith.cmpf ogt, %31, %32 : vector<1x128xf32>
    %cst_25 = arith.constant 2.000000e+01 : f32
    %34 = vector.broadcast %cst_25 : f32 to vector<1x128xf32>
    %35 = arith.minimumf %31, %34 : vector<1x128xf32>
    %36 = math.exp %35 : vector<1x128xf32>
    %37 = math.log1p %36 : vector<1x128xf32>
    %38 = arith.select %33, %31, %37 : vector<1x128xi1>, vector<1x128xf32>
    %cst_26 = arith.constant 1.000000e-03 : f32
    %39 = vector.broadcast %cst_26 : f32 to vector<1x128xf32>
    %40 = arith.addf %39, %38 : vector<1x128xf32>
    %c1 = arith.constant 1 : index
    %c0_27 = arith.constant 0 : index
    %41 = vector.load %arg10[%c1, %c0_27] : memref<2x128xf32, #tpu.memory_space<vmem>>, vector<1x128xf32>
    tpu.vector_store %arg10[%c1, %c0_27], %40 {strides = array<i32>} : memref<2x128xf32, #tpu.memory_space<vmem>>, vector<1x128xf32>,
    return
  }
  func.func @transform_0(%arg0: i32) -> (i32, i32) {
    %c0_i32 = arith.constant 0 : i32
    %c0_i32_0 = arith.constant 0 : i32
    return %c0_i32, %arg0 : i32, i32
  }
  func.func @transform_1(%arg0: i32) -> (i32, i32) {
    %c0_i32 = arith.constant 0 : i32
    %c0_i32_0 = arith.constant 0 : i32
    %c0_i32_1 = arith.constant 0 : i32
    return %c0_i32, %c0_i32_0 : i32, i32
  }
  func.func @transform_2(%arg0: i32) -> (i32, i32) {
    %c0_i32 = arith.constant 0 : i32
    %c0_i32_0 = arith.constant 0 : i32
    %c0_i32_1 = arith.constant 0 : i32
    return %c0_i32, %c0_i32_0 : i32, i32
  }
  func.func @transform_3(%arg0: i32) -> (i32, i32) {
    %c0_i32 = arith.constant 0 : i32
    %c0_i32_0 = arith.constant 0 : i32
    %c0_i32_1 = arith.constant 0 : i32
    return %c0_i32, %c0_i32_0 : i32, i32
  }
  func.func @transform_4(%arg0: i32) -> (i32, i32) {
    %c0_i32 = arith.constant 0 : i32
    %c0_i32_0 = arith.constant 0 : i32
    %c0_i32_1 = arith.constant 0 : i32
    return %c0_i32, %c0_i32_0 : i32, i32
  }
  func.func @transform_5(%arg0: i32) -> (i32, i32) {
    %c0_i32 = arith.constant 0 : i32
    %c0_i32_0 = arith.constant 0 : i32
    %c0_i32_1 = arith.constant 0 : i32
    return %c0_i32, %c0_i32_0 : i32, i32
  }
  func.func @transform_6(%arg0: i32) -> (i32, i32) {
    %c0_i32 = arith.constant 0 : i32
    %c0_i32_0 = arith.constant 0 : i32
    %c0_i32_1 = arith.constant 0 : i32
    return %c0_i32, %c0_i32_0 : i32, i32
  }
  func.func @transform_7(%arg0: i32) -> (i32, i32) {
    %c0_i32 = arith.constant 0 : i32
    %c0_i32_0 = arith.constant 0 : i32
    %c0_i32_1 = arith.constant 0 : i32
    return %c0_i32, %c0_i32_0 : i32, i32
  }
  func.func @transform_8(%arg0: i32) -> (i32, i32) {
    %c0_i32 = arith.constant 0 : i32
    %c0_i32_0 = arith.constant 0 : i32
    %c0_i32_1 = arith.constant 0 : i32
    return %c0_i32, %c0_i32_0 : i32, i32
  }
  func.func @transform_9(%arg0: i32) -> (i32, i32) {
    %c0_i32 = arith.constant 0 : i32
    %c0_i32_0 = arith.constant 0 : i32
    return %c0_i32, %arg0 : i32, i32
  }
}

</mosaic_0001>

<bundles_post_ra>
// kernel: tpu_custom_call.1
= control target key start
LH: loop header
LB: loop body
LE: loop exit
PB: predicated region body
PF: predicated region fallthrough
CT: control target
= control target key end

     0   :  { %14 = vsyncpa [#allocation3], 0  ;;  %s1308_s0 = inlined_call_operand.vmem [shape: bf16[8,256], index: 0, kind: input, shape index: {}]   ;;  %s1309_s1 = inlined_call_operand.vmem [shape: bf16[32,8], index: 1, kind: input, shape index: {}]   ;;  %s1310_s2 = inlined_call_operand.vmem [shape: bf16[32,32], index: 2, kind: input, shape index: {}]   ;;  %s1311_s3 = inlined_call_operand.vmem [shape: bf16[128,32], index: 3, kind: input, shape index: {}]   ;;  %s1312_s4 = inlined_call_operand.vmem [shape: bf16[8,128], index: 4, kind: input, shape index: {}]   ;;  %s1313_s5 = inlined_call_operand.vmem [shape: f32[32,1], index: 5, kind: input, shape index: {}]   ;;  %s1314_s6 = inlined_call_operand.vmem [shape: f32[32,1], index: 6, kind: input, shape index: {}]   ;;  %s1315_s7 = inlined_call_operand.vmem [shape: f32[128,1], index: 7, kind: input, shape index: {}]   ;;  %s1316_s8 = inlined_call_operand.vmem [shape: f32[8,1], index: 8, kind: input, shape index: {}]   ;;  %s1317_s9 = inlined_call_operand.hbm [shape: f32[2,256], index: 9, kind: output, shape index: {}]  }
   0x1   :  { %16 = vsyncpa [#allocation3 + $0x1], 0  ;;  %s1089_s30 = smov 0   ;;  %s1091_s10 = smov 0  }
   0x2   :  { %s1093_s11 = smov 0   ;;  %s1095_s12 = smov 0  }
   0x3 LB: > { %s1110_s13 = sadd.s32 4294967295, %s1036_s12   ;;  %s835_s14 = sadd.s32 4294967294, %s1036_s12   ;;  %s1036_s12 = sphi %s1095_s12, %s1323_s12   ;;  %s1032_s11 = sphi %s1093_s11, %s1322_s11   ;;  %s1028_s10 = sphi %s1091_s10, %s1321_s10   ;;  %s1024_s30 = sphi %s1089_s30, %s1320_s30  }
   0x4   : > { %s1114_s15 = sadd.s32 1, %s1036_s12   ;;  %s223_s16 = sadd.s32 1, %s1032_s11 }
   0x5   : > { %s220_s17 = ssub.s32 %s1036_s12, %s1114_s15  ;;  %p233_p0 = scmp.ne.s32.totalorder %s1032_s11, %s1028_s10 }
   0x6   : > { %p221_p1 = scmp.eq.s32.totalorder %s220_s17, 0  ;;  %p234_p2 = scmp.eq.s32.totalorder %s1110_s13, 1 }
   0x7   : > { %p239_p3 = scmp.ne.s32.totalorder %s1028_s10, %s1024_s30  ;;  %p240_p4 = scmp.eq.s32.totalorder %s835_s14, 1 }
   0x8   : > { %s1125_s18 = scalar_select %p221_p1, %s1032_s11, %s223_s16  }
   0x9   : > { %p1127_p5 = por %p234_p2, %p233_p0  ;;  %p1131_p6 = por %p240_p4, %p239_p3 }
   0xa   : > { %p838_p7 = scmp.ge.s32.totalorder %s1036_s12, 1  ;;  %p289_p8 = scmp.lt.s32.totalorder %s1036_s12, 3 }
   0xc   : > { %p290_p9 = pnand %p838_p7, %p289_p8 }
   0xd   : > { %p324_p10 = scmp.lt.s32.totalorder (!%p290_p9), %s1110_s13, 1  ;;  %s321_s14 = sand.u32 (!%p290_p9), 1, %s1028_s10  }
   0xe   : > { %293 = sbr.rel (%p290_p9) target bundleno = 747 (0x2eb), region = 56  ;;  %s839_s16 = sshll.u32 (!%p290_p9), %s321_s14, 1 }
   0xf   : > { %s323_s17 = scalar_lea.vmem (!%p290_p9), [#allocation2], %s839_s16  ;;  %s902_s21 = sshll.u32 (!%p290_p9), %s1110_s13, 1 }
  0x10   : > { %s771_s24 = scalar_lea.hbm (!%p290_p9), %s1317_s9, %s902_s21  ;;  %s994_s21 = scalar_lea.hbm (!%p290_p9), %s1317_s9, 4 }
  0x13   : > { %v336_v0 = vld [vmem:[%s1313_s5 + $0x10] sm:$0xff]  ;;  %v334_v1 = vld [vmem:[%s1313_s5] sm:$0xff]  ;;  %v1038_v2 = vmov 0   ;;  %s325_s25 = scalar_select %p324_p10, %s1110_s13, 1  ;;  %vm375_vm0 = vcmask 1043456   ;;  %v337_v5 = vld [vmem:[%s1313_s5 + $0x18] sm:$0xff] }
  0x14   : > { %960 = vset.pattern.permute.xlu1 %v1038_v2  ;;  %959 = vset.pattern.permute.xlu0 %v1038_v2  ;;  %v335_v6 = vld [vmem:[%s1313_s5 + $0x8] sm:$0xff]  ;;  %v905_v7 = vld [vmem:[%s1309_s1] sm:$0xff]  ;;  %vm368_vm1 = vcmask 64512   ;;  %v505_v10 = vld [vmem:[%s1315_s7 + $0x78] sm:$0xff]  ;;  %vm442_vm2 = vcmask 261120   ;;  %s761_s13 = scalar_lea.sflag [#allocation3], %s321_s14 }
  0x15   : > { %350 = vperm.xlu0 %959, %v336_v0   ;;  %340 = vperm.xlu1 %960, %v334_v1   ;;  %s840_s26 = sshll.u32 %s325_s25, 2  ;;  %v408_v8 = vld [vmem:[%s1314_s6] sm:$0xff]  ;;  %v409_v9 = vld [vmem:[%s1314_s6 + $0x8] sm:$0xff]  ;;  %v500_v13 = vld [vmem:[%s1315_s7 + $0x50] sm:$0xff]  ;;  %s773_s25 = sshll.u32 %s323_s17, 4  ;;  %s774_s25 = int_to_ptr.vmem [resolvable:$true] %s773_s25 }
  0x16   : > { %961 = vset.pattern.permute.xlu2 %v1038_v2  ;;  %s327_s29 = scalar_lea.vmem %s1308_s0, %s840_s26  ;;  %v502_v11 = vld [vmem:[%s1315_s7 + $0x60] sm:$0xff]  ;;  %v906_v12 = vld [vmem:[%s1309_s1 + $0x8] sm:$0xff]  ;;  %v501_v14 = vld [vmem:[%s1315_s7 + $0x58] sm:$0xff]  ;;  %s775_s26 = sshll.u32 %s771_s24, 4  ;;  %s776_s26 = int_to_ptr.hbm [resolvable:$true] %s775_s26 }
  0x17   : > { %v329_v3 = vld [vmem:[%s327_s29] sm:$0xf]  ;;  %v499_v15 = vld [vmem:[%s1315_s7 + $0x48] sm:$0xff]  ;;  %v496_v16 = vld [vmem:[%s1315_s7 + $0x30] sm:$0xff]  ;;  %s988_s27 = sshra.s32 %s776_s26, 4  ;;  %s989_s27 = int_to_ptr.hbm [resolvable:$true] %s988_s27 }
  0x18   : > { %v377_v4 = vsel %vm375_vm0, %v329_v3, 0  ;;  %v494_v17 = vld [vmem:[%s1315_s7 + $0x20] sm:$0xff]  ;;  %v495_v18 = vld [vmem:[%s1315_s7 + $0x28] sm:$0xff]  ;;  %v493_v19 = vld [vmem:[%s1315_s7 + $0x18] sm:$0xff]  ;;  %s990_s28 = scalar_lea.hbm %s989_s27, 2  ;;  %p995_p0 = scmp.lt.s32.totalorder %s989_s27, %s1317_s9 }
  0x19   : > { %386 = vmatpush.bf16.msra.mxu1 %v377_v4  ;;  %v490_v20 = vld [vmem:[%s1315_s7] sm:$0xff]  ;;  %v410_v23 = vld [vmem:[%s1314_s6 + $0x10] sm:$0xff]  ;;  %v411_v25 = vld [vmem:[%s1314_s6 + $0x18] sm:$0xff]  ;;  %p991_p11 = scmp.ne.s32.totalorder %s989_s27, %s990_s28  ;;  %p996_p1 = scmp.lt.s32.totalorder %s994_s21, %s990_s28 }
  0x1a   : > { %v724_v21 = vld [vmem:[%s1316_s8] sm:$0xff]  ;;  %424 = vperm.xlu2 %961, %v410_v23   ;;  %v504_v29 = vld [vmem:[%s1315_s7 + $0x70] sm:$0xff]  ;;  %v503_v30 = vld [vmem:[%s1315_s7 + $0x68] sm:$0xff] }
  0x1b   : > { %v498_v42 = vld [vmem:[%s1315_s7 + $0x40] sm:$0xff]  ;;  %v497_v46 = vld [vmem:[%s1315_s7 + $0x38] sm:$0xff]  ;;  %v492_v47 = vld [vmem:[%s1315_s7 + $0x10] sm:$0xff]  ;;  %p992_p12 = pnand %p991_p11, %p1127_p5  ;;  %p997_p2 = por %p996_p1, %p995_p0 }
  0x1c   : > { %849 = vmatmul.msk.bf16.vlgmr.msra.gmra.mxu1 %vm368_vm1, %v905_v7  ;;  %v907_v45 = vld [vmem:[%s1310_s2] sm:$0xff]  ;;  %v908_v48 = vld [vmem:[%s1310_s2 + $0x8] sm:$0xff] }
  0x1d   : > { %355 = vperm.xlu0 %959, %v337_v5   ;;  %345 = vperm.xlu1 %960, %v335_v6   ;;  %v491_v49 = vld [vmem:[%s1315_s7 + $0x8] sm:$0xff]  ;;  %v909_v4 = vld [vmem:[%s1311_s3] sm:$0xff]  ;;  %p993_p13 = pneg %p992_p12 }
  0x1e   : > { %v913_v5 = vld [vmem:[%s1311_s3 + $0x20] sm:$0xff]  ;;  %v910_v6 = vld [vmem:[%s1311_s3 + $0x8] sm:$0xff] }
  0x1f   : > { %v914_v7 = vld [vmem:[%s1311_s3 + $0x28] sm:$0xff]  ;;  %p998_p3 = pnand %p997_p2, %p993_p13 }
  0x22   : > { %429 = vperm.xlu2 %961, %v411_v25  }
  0x25   : > { %414 = vperm.xlu0 %959, %v408_v8   ;;  %419 = vperm.xlu1 %960, %v409_v9   ;;  %v911_v8 = vld [vmem:[%s1311_s3 + $0x10] sm:$0xff] }
  0x26   : > { %v915_v9 = vld [vmem:[%s1311_s3 + $0x30] sm:$0xff] }
  0x2a   : > { %578 = vperm.xlu2 %961, %v504_v29  }
  0x2c   : > { %850 = vmatmul.msk.bf16.gmra.mxu1 %vm368_vm1, %v906_v12 }
  0x2d   : > { %583 = vperm.xlu0 %959, %v505_v10   ;;  %568 = vperm.xlu1 %960, %v502_v11   ;;  %v912_v10 = vld [vmem:[%s1311_s3 + $0x18] sm:$0xff] }
  0x2e   : > { %v916_v11 = vld [vmem:[%s1311_s3 + $0x38] sm:$0xff] }
  0x32   : > { %573 = vperm.xlu2 %961, %v503_v30  }
  0x35   : > { %558 = vperm.xlu0 %959, %v500_v13   ;;  %563 = vperm.xlu1 %960, %v501_v14  }
  0x3a   : > { %548 = vperm.xlu2 %961, %v498_v42  }
  0x3d   : > { %553 = vperm.xlu0 %959, %v499_v15   ;;  %538 = vperm.xlu1 %960, %v496_v16  }
  0x42   : > { %543 = vperm.xlu2 %961, %v497_v46  }
  0x45   : > { %528 = vperm.xlu0 %959, %v494_v17   ;;  %533 = vperm.xlu1 %960, %v495_v18  }
  0x4a   : > { %518 = vperm.xlu2 %961, %v492_v47  }
  0x4d   : > { %523 = vperm.xlu0 %959, %v493_v19   ;;  %508 = vperm.xlu1 %960, %v490_v20  }
  0x52   : > { %513 = vperm.xlu2 %961, %v491_v49  }
  0x55   : > { %727 = vperm.xlu0 %959, %v724_v21  }
  0x74   : > { %v425_v52 = vpop.permute.xlu2 %424 }
  0x7c   : > { %v430_v56 = vpop.permute.xlu2 %429 }
  0x84   : > { %v579_v20 = vpop.permute.xlu2 %578 }
  0x87   : > { %v351_v26 = vpop.permute.xlu0 %350  ;;  %v341_v27 = vpop.permute.xlu1 %340 }
  0x8f   : > { %v356_v31 = vpop.permute.xlu0 %355  ;;  %v346_v33 = vpop.permute.xlu1 %345 }
  0x97   : > { %v420_v55 = vpop.permute.xlu1 %419  ;;  %v415_v60 = vpop.permute.xlu0 %414 }
  0x99   : > { %v388_v22 = vpop.f32.mrf.mxu1 }
  0x9a   : > { %v389_v37 = vadd.f32 %v388_v22, %v341_v27 }
  0x9c   : > { %v398_v43 = vmax.f32 %v389_v37, 0.0 }
  0x9f   : > { %v584_v22 = vpop.permute.xlu0 %583 }
  0xa1   : > { %v390_v24 = vpop.f32.mrf.mxu1 }
  0xa2   : > { %v391_v35 = vadd.f32 %v390_v24, %v346_v33  ;;  %v574_v24 = vpop.permute.xlu2 %573 }
  0xa4   : > { %v399_v40 = vmax.f32 %v391_v35, 0.0 }
  0xa6   : > { %v406_v44 = vpack.c.bf16 %v399_v40, %v398_v43 }
  0xa7   : > { %v559_v27 = vpop.permute.xlu0 %558 }
  0xa9   : > { %v393_v28 = vpop.f32.mrf.mxu1 }
  0xaa   : > { %v394_v32 = vadd.f32 %v393_v28, %v351_v26  ;;  %v569_v26 = vpop.permute.xlu1 %568  ;;  %v549_v30 = vpop.permute.xlu2 %548 }
  0xac   : > { %v400_v38 = vmax.f32 %v394_v32, 0.0 }
  0xaf   : > { %v554_v32 = vpop.permute.xlu0 %553 }
  0xb1   : > { %v395_v34 = vpop.f32.mrf.mxu1 }
  0xb2   : > { %v396_v36 = vadd.f32 %v395_v34, %v356_v31  ;;  %v564_v31 = vpop.permute.xlu1 %563 }
  0xb4   : > { %v401_v39 = vmax.f32 %v396_v36, 0.0 }
  0xb6   : > { %v407_v41 = vpack.c.bf16 %v401_v39, %v400_v38 }
  0xb8   : > { %455 = vmatpush.bf16.msrb.mxu1 %v407_v41  ;;  %v544_v41 = vpop.permute.xlu2 %543 }
  0xbc   : > { %456 = vmatpush.bf16.msrb.mxu1 %v406_v44 }
  0xbf   : > { %859 = vmatmul.msk.bf16.vlgmr.msrb.gmra.mxu1 %vm442_vm2, %v907_v45  ;;  %v539_v45 = vpop.permute.xlu1 %538 }
  0xcf   : > { %860 = vmatmul.msk.bf16.gmra.mxu1 %vm442_vm2, %v908_v48 }
 0x13c   : > { %v458_v50 = vpop.f32.mrf.mxu1 }
 0x13d   : > { %v459_v61 = vadd.f32 %v458_v50, %v415_v60 }
 0x144   : > { %v460_v51 = vpop.f32.mrf.mxu1 }
 0x145   : > { %v461_v58 = vadd.f32 %v460_v51, %v420_v55  ;;  %v529_v51 = vpop.permute.xlu0 %528 }
 0x14c   : > { %v463_v53 = vpop.f32.mrf.mxu1 }
 0x14d   : > { %v464_v54 = vadd.f32 %v463_v53, %v425_v52 }
 0x14f   : > { %962 = vtanh.f32 %v464_v54 }
 0x154   : > { %v465_v57 = vpop.f32.mrf.mxu1 }
 0x155   : > { %v466_v59 = vadd.f32 %v465_v57, %v430_v56  ;;  %v963_v62 = vpop.eup %962 }
 0x157   : > { %964 = vtanh.f32 %v466_v59 }
 0x158   : > { %966 = vtanh.f32 %v461_v58  ;;  %v519_v58 = vpop.permute.xlu2 %518 }
 0x159   : > { %968 = vtanh.f32 %v459_v61  ;;  %v534_v61 = vpop.permute.xlu1 %533 }
 0x15d   : > { %v965_v63 = vpop.eup %964 }
 0x15e   : > { %v489_v0 = vpack.c.bf16 %v965_v63, %v963_v62  ;;  %v967_v1 = vpop.eup %966 }
 0x15f   : > { %v969_v2 = vpop.eup %968 }
 0x160   : > { %656 = vmatpush.bf16.msra.mxu0 %v489_v0  ;;  %917 = vmatpush.bf16.msra.mxu2 %v489_v0  ;;  %v488_v3 = vpack.c.bf16 %v967_v1, %v969_v2 }
 0x164   : > { %657 = vmatpush.bf16.msra.mxu0 %v488_v3  ;;  %918 = vmatpush.bf16.msra.mxu2 %v488_v3  ;;  %v524_v3 = vpop.permute.xlu0 %523 }
 0x167   : > { %893 = vmatmul.msk.bf16.vlgmr.msra.gmra.mxu0 %vm442_vm2, %v909_v4  ;;  %897 = vmatmul.msk.bf16.vlgmr.msra.gmra.mxu2 %vm442_vm2, %v913_v5 }
 0x177   : > { %894 = vmatmul.msk.bf16.gmra.mxu0 %vm442_vm2, %v910_v6  ;;  %898 = vmatmul.msk.bf16.gmra.mxu2 %vm442_vm2, %v914_v7 }
 0x187   : > { %895 = vmatmul.msk.bf16.gmra.mxu0 %vm442_vm2, %v911_v8  ;;  %899 = vmatmul.msk.bf16.gmra.mxu2 %vm442_vm2, %v915_v9  ;;  %v514_v9 = vpop.permute.xlu2 %513 }
 0x197   : > { %896 = vmatmul.msk.bf16.gmra.mxu0 %vm442_vm2, %v912_v10  ;;  %900 = vmatmul.msk.bf16.gmra.mxu2 %vm442_vm2, %v916_v11 }
 0x1e4   : > { %v1263_v12 = vpop.f32.mrf.mxu0 }
 0x1ea   : > { %v679_v13 = vpop.f32.mrf.mxu2 }
 0x1eb   : > { %v680_v53 = vadd.f32 %v679_v13, %v549_v30 }
 0x1ec   : > { %v1265_v14 = vpop.f32.mrf.mxu0 }
 0x1ed   : > { %v707_v59 = vmax.f32 %v680_v53, 0.0  ;;  %v662_v10 = vadd.f32 %v1265_v14, %v514_v9  ;;  %v728_v14 = vpop.permute.xlu0 %727 }
 0x1f2   : > { %v681_v15 = vpop.f32.mrf.mxu2 }
 0x1f3   : > { %v682_v48 = vadd.f32 %v681_v15, %v554_v32  ;;  %v509_v15 = vpop.permute.xlu1 %508 }
 0x1f4   : > { %v664_v16 = vpop.f32.mrf.mxu0 }
 0x1f5   : > { %v708_v55 = vmax.f32 %v682_v48, 0.0  ;;  %v665_v7 = vadd.f32 %v664_v16, %v519_v58  ;;  %v715_v16 = vld [vmem:[%s1312_s4] sm:$0xf] }
 0x1f7   : > { %v720_v0 = vpack.c.bf16 %v708_v55, %v707_v59 }
 0x1fa   : > { %v684_v17 = vpop.f32.mrf.mxu2 }
 0x1fb   : > { %v685_v46 = vadd.f32 %v684_v17, %v559_v27  ;;  %v660_v17 = vadd.f32 %v1263_v12, %v509_v15 }
 0x1fc   : > { %v666_v19 = vpop.f32.mrf.mxu0 }
 0x1fd   : > { %v709_v54 = vmax.f32 %v685_v46, 0.0  ;;  %v667_v4 = vadd.f32 %v666_v19, %v524_v3  ;;  %v699_v19 = vmax.f32 %v660_v17, 0.0 }
 0x1ff   : > { %v702_v11 = vmax.f32 %v667_v4, 0.0 }
 0x202   : > { %v686_v18 = vpop.f32.mrf.mxu2 }
 0x203   : > { %v687_v42 = vadd.f32 %v686_v18, %v564_v31  ;;  %v701_v18 = vmax.f32 %v665_v7, 0.0 }
 0x204   : > { %v669_v23 = vpop.f32.mrf.mxu0 }
 0x205   : > { %v710_v49 = vmax.f32 %v687_v42, 0.0  ;;  %v670_v1 = vadd.f32 %v669_v23, %v529_v51 }
 0x207   : > { %v721_v57 = vpack.c.bf16 %v710_v49, %v709_v54  ;;  %v703_v8 = vmax.f32 %v670_v1, 0.0 }
 0x20a   : > { %v689_v21 = vpop.f32.mrf.mxu2 }
 0x20b   : > { %v690_v38 = vadd.f32 %v689_v21, %v569_v26  ;;  %v717_v21 = vpack.c.bf16 %v702_v11, %v701_v18 }
 0x20c   : > { %v671_v28 = vpop.f32.mrf.mxu0 }
 0x20d   : > { %v711_v47 = vmax.f32 %v690_v38, 0.0  ;;  %v672_v62 = vadd.f32 %v671_v28, %v534_v61 }
 0x20f   : > { %v704_v5 = vmax.f32 %v672_v62, 0.0 }
 0x211   : > { %v718_v13 = vpack.c.bf16 %v704_v5, %v703_v8 }
 0x212   : > { %v691_v25 = vpop.f32.mrf.mxu2 }
 0x213   : > { %v692_v36 = vadd.f32 %v691_v25, %v574_v24 }
 0x214   : > { %v674_v34 = vpop.f32.mrf.mxu0 }
 0x215   : > { %v712_v43 = vmax.f32 %v692_v36, 0.0  ;;  %v675_v60 = vadd.f32 %v674_v34, %v539_v45 }
 0x217   : > { %v722_v50 = vpack.c.bf16 %v712_v43, %v711_v47  ;;  %v705_v2 = vmax.f32 %v675_v60, 0.0 }
 0x21a   : > { %v694_v29 = vpop.f32.mrf.mxu2 }
 0x21b   : > { %v695_v33 = vadd.f32 %v694_v29, %v579_v20  ;;  %v700_v20 = vmax.f32 %v662_v10, 0.0 }
 0x21c   : > { %v676_v52 = vpop.f32.mrf.mxu0 }
 0x21d   : > { %v713_v39 = vmax.f32 %v695_v33, 0.0  ;;  %v677_v56 = vadd.f32 %v676_v52, %v544_v41 }
 0x21f   : > { %v706_v63 = vmax.f32 %v677_v56, 0.0 }
 0x221   : > { %v719_v6 = vpack.c.bf16 %v706_v63, %v705_v2 }
 0x222   : > { %v696_v35 = vpop.f32.mrf.mxu2 }
 0x223   : > { %v697_v37 = vadd.f32 %v696_v35, %v584_v22  ;;  %v716_v22 = vpack.c.bf16 %v700_v20, %v699_v19 }
 0x225   : > { %v714_v40 = vmax.f32 %v697_v37, 0.0 }
 0x227   : > { %v723_v44 = vpack.c.bf16 %v714_v40, %v713_v39 }
 0x229   : > { %730 = vmatpush.bf16.msra.mxu3 %v723_v44 }
 0x22d   : > { %731 = vmatpush.bf16.msra.mxu3 %v722_v50 }
 0x231   : > { %732 = vmatpush.bf16.msra.mxu3 %v721_v57 }
 0x235   : > { %733 = vmatpush.bf16.msra.mxu3 %v720_v0 }
 0x239   : > { %734 = vmatpush.bf16.msra.mxu3 %v719_v6 }
 0x23d   : > { %735 = vmatpush.bf16.msra.mxu3 %v718_v13 }
 0x241   : > { %736 = vmatpush.bf16.msra.mxu3 %v717_v21 }
 0x245   : > { %737 = vmatpush.bf16.msra.mxu3 %v716_v22 }
 0x248   : > { %738 = vmatmul.bf16.vlgmr.msra.gmra.mxu3 %v715_v16 }
 0x2cb   : > { %v739_v23 = vpop.f32.mrf.mxu3 }
 0x2cc   : > { %v740_v12 = vadd.f32 %v739_v23, %v728_v14 }
 0x2ce   : > { %v745_v24 = vmin.f32 %v740_v12, 20.0  ;;  %743 = vst [vmem:[%s323_s17] sm:$0x1] %v740_v12  ;;  %vm744_vm4 = vcmp.gt.f32.partialorder %v740_v12, 20.0 }
 0x2d0   : > { %v746_v25 = vmul.f32 1.442695, %v745_v24 }
 0x2d2   : > { %970 = vpow2.f32 %v746_v25 }
 0x2d3   : > { %v741_v26 = vpop.f32.mrf.mxu3 }
 0x2d8   : > { %v971_v27 = vpop.eup %970 }
 0x2d9   : > { %v748_v28 = vadd.f32 1.0, %v971_v27  ;;  %v751_v29 = vmul.f32 -0.5, %v971_v27  ;;  %v754_v31 = vand.u32 2147483647, %v971_v27 }
 0x2db   : > { %972 = vlog2.f32 %v748_v28  ;;  %v752_v30 = vadd.f32 1.0, %v751_v29  ;;  %vm755_vm3 = vcmp.lt.f32.partialorder %v754_v31, 0.0004427343 }
 0x2dd   : > { %v753_v34 = vmul.f32 %v971_v27, %v752_v30 }
 0x2e1   : > { %v973_v32 = vpop.eup %972 }
 0x2e2   : > { %v750_v33 = vmul.f32 0.6931472, %v973_v32 }
 0x2e4   : > { %v756_v35 = vsel %vm755_vm3, %v753_v34, %v750_v33 }
 0x2e5   : > { %v757_v36 = vsel %vm744_vm4, %v740_v12, %v756_v35 }
 0x2e6   : > { %v758_v37 = vadd.f32 0.001, %v757_v36 }
 0x2e8   : > { %759 = vst [vmem:[%s323_s17] sm:$0x2] %v758_v37 }
 0x2e9   : > { %1001 = shalt.err (!%p998_p3)
}
 0x2ea   : > { %919 = dma.vmem_to_hbm [thread:$0]  (%p1127_p5), %s774_s25, 32, %s776_s26, %s761_s13  }
 0x2eb PF: > { %p925_p4 = scmp.ge.s32.totalorder %s1036_s12, 2  ;;  %s787_s14 = sand.u32 1, %s1024_s30  }
 0x2ec   : > { %s788_s17 = scalar_lea.sflag [#allocation3], %s787_s14 }
 0x2ed   : > { %p922_p7 = pnand %p925_p4, %p1131_p6 }
 0x2ef   : > { %p923_p8 = pneg %p922_p7 }
 0x2f1   : > { %1019 = dma.done.wait (%p923_p8), %s788_s17, 32  }
 0x2f2   : > { %1021 = vsyncadd (%p923_p8), %s788_s17, 4294967264  ;;  %p19_p9 = scmp.ge.s32.totalorder %s1114_s15, 4   ;;  %s1320_s30 = smov %s1028_s10 }
 0x2f3   : > { %s1321_s10 = smov %s1032_s11  ;;  %s1322_s11 = smov %s1125_s18 }
 0x2f4   : > { %s1323_s12 = smov %s1114_s15  ;;  %21 = sbr.rel (!%p19_p9) target bundleno = 3 (0x3), region = 91 }
 0x2f9   :  { %794 = vsyncpa [#allocation3], 1 }
 0x2fa   :  { %796 = vsyncpa [#allocation3 + $0x1], 1 }

</bundles_post_ra>
